<compile_context>
chip_gen: v5e
topology: v5e:2x2
jax: 0.10.0
libtpu: 0.0.40
codegen_flags: <defaults>
</compile_context>

<pallas_src>
import jax
import jax.numpy as jnp
from jax.experimental import pallas as pl
from jax.experimental.pallas import tpu as pltpu

_LANE = 128
_SMALL_N = 65536                 # below this, XLA's fused tanh beats launch cost
_TARGET_BLOCK_BYTES = 8 << 20    # ~8 MiB per block (per array)
_VMEM_LIMIT_BYTES = 40 << 20     # 2 bufs x (in+out) x 8 MiB = 32 MiB + headroom;
                                 # < 64 MiB physical (v7x), << 128 MiB (v5e/v6e)
_MIN_GRID_STEPS = 4              # keep both v7x TCs fed and the pipeline warm


def _make_tanh_kernel(flipped: bool):
    """tanh(x) or tanh(-x); `flipped` is a compile-time constant (closure)."""

    def kernel(x_ref, o_ref):
        x = x_ref[...]
        if flipped:
            x = -x
        o_ref[...] = jnp.tanh(x)

    return kernel


def _sublane_multiple(dtype) -> int:
    """Row-block alignment: 8 rows for 32-bit, 16 for 16-bit, 32 for 8-bit."""
    itemsize = jnp.dtype(dtype).itemsize
    return 8 * max(1, 4 // itemsize)


def _pick_lanes(x):
    """Lane width for a lane-dense 2D view of x, or None if n % 128 != 0."""
    n = x.size
    if n % _LANE != 0:
        return None
    last = x.shape[-1] if x.ndim else n
    itemsize = jnp.dtype(x.dtype).itemsize
    row_mult = _sublane_multiple(x.dtype)
    # Preferred: keep the native minor dim -> reshape only collapses major
    # dims, which is a bitcast on the (8,128)-tiled HBM layout (no relayout).
    if last % _LANE == 0 and row_mult * last * itemsize <= _TARGET_BLOCK_BYTES:
        return last
    # Otherwise pick the widest 128-multiple dividing n; the kernel stays
    # lane-dense / unmasked even if XLA has to relayout the reshape.
    for lanes in (2048, 1024, 512, 256, _LANE):
        if n % lanes == 0:
            return lanes
    return None  # unreachable: n % 128 == 0 guarantees the loop returns


def tanh_nl_pallas(x, flipped=False):
    """Elementwise tanh (optionally of -x). Any shape; same shape/dtype out."""
    orig_shape = x.shape
    dtype = x.dtype
    n = x.size
    itemsize = jnp.dtype(dtype).itemsize

    # Fast paths: tiny tensors (launch overhead dominates) and non-128-
    # divisible sizes (a pad + slice round trip would ~3x the HBM traffic of
    # this mem-bound op).  XLA's fused elementwise tanh is already optimal.
    if n < _SMALL_N:
        return jnp.tanh(-x) if flipped else jnp.tanh(x)
    lanes = _pick_lanes(x)
    if lanes is None:
        return jnp.tanh(-x) if flipped else jnp.tanh(x)

    rows = n // lanes
    x2d = x.reshape(rows, lanes)

    row_mult = _sublane_multiple(dtype)
    tile_rows = (_TARGET_BLOCK_BYTES // (lanes * itemsize)) // row_mult * row_mult
    tile_rows = max(row_mult, tile_rows)
    # Keep at least _MIN_GRID_STEPS grid steps when there is enough data so a
    # core-sharded grid (2 TCs on v7x) never leaves one core idle.
    if rows >= _MIN_GRID_STEPS * row_mult:
        cap = (rows // _MIN_GRID_STEPS) // row_mult * row_mult
        tile_rows = min(tile_rows, max(row_mult, cap))
    tile_rows = min(tile_rows, rows)  # full-extent block is always legal

    grid = (pl.cdiv(rows, tile_rows),)  # ragged last block is masked by Pallas

    cost = pl.CostEstimate(
        flops=n,
        transcendentals=n,
        bytes_accessed=2 * n * itemsize,
    )

    out2d = pl.pallas_call(
        _make_tanh_kernel(bool(flipped)),
        out_shape=jax.ShapeDtypeStruct((rows, lanes), dtype),
        grid_spec=pltpu.PrefetchScalarGridSpec(
            num_scalar_prefetch=0,
            grid=grid,
            in_specs=[pl.BlockSpec((tile_rows, lanes), lambda i: (i, 0))],
            out_specs=pl.BlockSpec((tile_rows, lanes), lambda i: (i, 0)),
        ),
        compiler_params=pltpu.CompilerParams(
            # NOTE(v7x): verify in xprof that both TensorCores stream; if not,
            # switch this axis to pltpu.CORE_PARALLEL (or an explicit core
            # mesh) — the grid already has >= _MIN_GRID_STEPS steps so each
            # core gets work.
            dimension_semantics=("parallel",),
            vmem_limit_bytes=_VMEM_LIMIT_BYTES,
        ),
        cost_estimate=cost,
    )(x2d)

    return out2d.reshape(orig_shape)


class TanhNLPallas:
    """Mirror of the PyTorch Tanh_NL module's forward."""

    def __init__(self, flipped=False):
        self.flipped = bool(flipped)

    def forward(self, x):
        return tanh_nl_pallas(x, flipped=self.flipped)

    def __call__(self, x):
        return self.forward(x)


if __name__ == "__main__":
    key = jax.random.PRNGKey(0)
    k1, k2, k3 = jax.random.split(key, 3)

    # 1) Small NCHW-like input (typical module usage) -> small-n fast path.
    x_small = jax.random.normal(k1, (2, 4, 16, 16), dtype=jnp.float32)
    mod = TanhNLPallas(flipped=False)
    out = jax.block_until_ready(mod(x_small))
    ref = jnp.tanh(x_small)
    assert out.shape == x_small.shape and out.dtype == x_small.dtype
    assert jnp.allclose(out, ref, atol=1e-6, rtol=1e-6), "mismatch vs tanh(x)"

    mod_f = TanhNLPallas(flipped=True)
    out_f = jax.block_until_ready(mod_f(x_small))
    ref_f = jnp.tanh(-x_small)
    assert jnp.allclose(out_f, ref_f, atol=1e-6, rtol=1e-6), "mismatch vs tanh(-x)"

    # 2) Larger (still modest) input that exercises the Pallas streaming path:
    #    n = 131072 >= _SMALL_N, trailing dim 128 -> lane-dense bitcast view.
    x_big = jax.random.normal(k2, (2, 4, 128, 128), dtype=jnp.float32)
    out_big = jax.block_until_ready(mod(x_big))
    assert out_big.shape == x_big.shape and out_big.dtype == x_big.dtype
    assert jnp.allclose(out_big, jnp.tanh(x_big), atol=1e-6, rtol=1e-6)

    out_big_f = jax.block_until_ready(mod_f(x_big))
    assert jnp.allclose(out_big_f, jnp.tanh(-x_big), atol=1e-6, rtol=1e-6)

    # 3) Ragged size (not a multiple of 128) -> fused-XLA fallback path.
    x_rag = jax.random.normal(k3, (3, 5, 7, 11), dtype=jnp.float32)
    out_rag = jax.block_until_ready(mod_f(x_rag))
    assert out_rag.shape == x_rag.shape and out_rag.dtype == x_rag.dtype
    assert jnp.allclose(out_rag, jnp.tanh(-x_rag), atol=1e-6, rtol=1e-6)

    print("KERNEL_OK")
</pallas_src>

<mosaic_0001>
module attributes {stable_mosaic.version = 11 : i64} {
  func.func @kernel(%arg0: i32, %arg1: memref<256x128xf32, #tpu.memory_space<vmem>>, %arg2: memref<256x128xf32, #tpu.memory_space<vmem>>) attributes {dimension_semantics = [#tpu.dimension_semantics<parallel>], iteration_bounds = array<i64: 4>, scalar_prefetch = 0 : i64, scratch_operands = 0 : i64, tpu.core_type = #tpu.core_type<tc>, window_params = [{transform_indices = @transform_0, window_bounds = array<i64: 256, 128>}, {transform_indices = @transform_1, window_bounds = array<i64: 256, 128>}]} {
    %c0 = arith.constant 0 : index
    %c0_0 = arith.constant 0 : index
    %0 = vector.load %arg1[%c0, %c0_0] : memref<256x128xf32, #tpu.memory_space<vmem>>, vector<256x128xf32>
    %1 = math.tanh %0 : vector<256x128xf32>
    %c0_1 = arith.constant 0 : index
    %c0_2 = arith.constant 0 : index
    %2 = vector.load %arg2[%c0_1, %c0_2] : memref<256x128xf32, #tpu.memory_space<vmem>>, vector<256x128xf32>
    tpu.vector_store %arg2[%c0_1, %c0_2], %1 {strides = array<i32>} : memref<256x128xf32, #tpu.memory_space<vmem>>, vector<256x128xf32>,
    return
  }
  func.func @transform_0(%arg0: i32) -> (i32, i32) {
    %c0_i32 = arith.constant 0 : i32
    %c0_i32_0 = arith.constant 0 : i32
    return %arg0, %c0_i32 : i32, i32
  }
  func.func @transform_1(%arg0: i32) -> (i32, i32) {
    %c0_i32 = arith.constant 0 : i32
    %c0_i32_0 = arith.constant 0 : i32
    return %arg0, %c0_i32 : i32, i32
  }
}

</mosaic_0001>

<bundles_post_ra>
// kernel: tpu_custom_call.1
= control target key start
LH: loop header
LB: loop body
LE: loop exit
PB: predicated region body
PF: predicated region fallthrough
CT: control target
= control target key end

     0   :  { %6 = vsyncpa [#allocation3], 0  ;;  %s760_s0 = inlined_call_operand.hbm [shape: f32[1024,128], index: 0, kind: input, shape index: {}]   ;;  %s761_s1 = inlined_call_operand.hbm [shape: f32[1024,128], index: 1, kind: output, shape index: {}]  }
   0x1   :  { %8 = vsyncpa [#allocation3 + $0x1], 0 }
   0x2   :  { %9 = vsyncpa [#allocation4], 0 }
   0x3   :  { %11 = vsyncpa [#allocation4 + $0x1], 0  ;;  %s566_s6 = smov 0   ;;  %s568_s7 = smov 0  }
   0x4   :  { %s570_s8 = smov 0   ;;  %s572_s9 = smov 0  }
   0x5 LB: > { %s587_s10 = sadd.s32 4294967295, %s550_s9   ;;  %s324_s11 = sadd.s32 4294967294, %s550_s9   ;;  %s550_s9 = sphi %s572_s9, %s770_s9   ;;  %s546_s8 = sphi %s570_s8, %s769_s8   ;;  %s542_s7 = sphi %s568_s7, %s768_s7   ;;  %s538_s6 = sphi %s566_s6, %s767_s6  }
   0x6   : > { %s591_s12 = sadd.s32 1, %s550_s9   ;;  %s24_s13 = sadd.s32 1, %s546_s8 }
   0x7   : > { %s21_s14 = ssub.s32 %s550_s9, %s591_s12  ;;  %p31_p0 = scmp.ne.s32.totalorder %s546_s8, %s542_s7 }
   0x8   : > { %p22_p1 = scmp.eq.s32.totalorder %s21_s14, 0  ;;  %p32_p2 = scmp.eq.s32.totalorder %s550_s9, 0 }
   0x9   : > { %p37_p3 = scmp.ne.s32.totalorder %s542_s7, %s538_s6  ;;  %p38_p4 = scmp.eq.s32.totalorder %s587_s10, 0 }
   0xa   : > { %s603_s15 = scalar_select %p22_p1, %s546_s8, %s24_s13  }
   0xb   : > { %p605_p5 = por %p32_p2, %p31_p0  ;;  %p609_p6 = por %p38_p4, %p37_p3 }
   0xc   : > { %p61_p7 = scmp.eq.s32.totalorder %s587_s10, 3  ;;  %p67_p8 = scmp.eq.s32.totalorder %s324_s11, 3 }
   0xd   : > { %p352_p9 = scmp.lt.s32.totalorder %s550_s9, 4  ;;  %s87_s20 = sand.u32 1, %s546_s8  }
   0xe   : > { %p615_p10 = por %p61_p7, %p31_p0  ;;  %p619_p11 = por %p67_p8, %p37_p3 }
   0xf   : > { %s338_s21 = sshll.u32 %s550_s9, 8  ;;  %s327_s22 = sshll.u32 %s87_s20, 8 }
  0x10   : > { %s96_s25 = scalar_lea.hbm %s760_s0, %s338_s21  ;;  %s91_s27 = scalar_lea.vmem [#allocation2], %s327_s22 }
  0x11   : > { %s97_s26 = sshll.u32 %s96_s25, 4  ;;  %s99_s28 = sshll.u32 %s91_s27, 4  ;;  %s98_s26 = int_to_ptr.hbm [resolvable:$true] %s97_s26  ;;  %s100_s28 = int_to_ptr.vmem [resolvable:$true] %s99_s28 }
  0x12   : > { %p630_p12 = pnand %p352_p9, %p605_p5  ;;  %p330_p13 = scmp.ge.s32.totalorder %s550_s9, 1 }
  0x13   : > { %p107_p0 = scmp.lt.s32.totalorder %s550_s9, 5  ;;  %s88_s30 = scalar_lea.sflag [#allocation3], %s87_s20 }
  0x14   : > { %s454_s2 = sshra.s32 %s98_s26, 4  ;;  %p458_p2 = pneg %p630_p12  ;;  %s455_s2 = int_to_ptr.hbm [resolvable:$true] %s454_s2 }
  0x15   : > { %s456_s3 = scalar_lea.hbm %s455_s2, 256  ;;  %s461_s11 = scalar_lea.hbm %s760_s0, 1024 }
  0x16   : > { %p457_p1 = scmp.ne.s32.totalorder %s455_s2, %s456_s3  ;;  %p462_p5 = scmp.lt.s32.totalorder %s455_s2, %s760_s0 }
  0x17   : > { %p463_p7 = scmp.lt.s32.totalorder %s461_s11, %s456_s3 }
  0x18   : > { %p459_p3 = pnand %p458_p2, %p457_p1 }
  0x19   : > { %p464_p8 = por %p463_p7, %p462_p5 }
  0x1a   : > { %p460_p4 = pneg %p459_p3 }
  0x1c   : > { %p465_p9 = pnand %p464_p8, %p460_p4 }
  0x1e   : > { %468 = shalt.err (!%p465_p9)
}
  0x1f   : > { %s552_s16 = smov 128   ;;  %s553_s20 = smov 8  }
  0x20   : > { %347 = dma.hbm_to_vmem [thread:$0]  (!%p630_p12), %s98_s26, 4096, %s100_s28, %s88_s30, %s552_s16, %s552_s16, %s553_s20  }
  0x21   : > { %p108_p1 = pnand %p330_p13, %p107_p0 }
  0x22   : > { %s651_s21 = sand.u32 (!%p108_p1), 1, %s542_s7  }
  0x23   : > { %111 = sbr.rel (%p108_p1) target bundleno = 84 (0x54), region = 24  ;;  %s331_s22 = sshll.u32 (!%p108_p1), %s651_s21, 8 }
  0x24   : > { %s114_s23 = scalar_lea.sflag (!%p108_p1), [#allocation3], %s651_s21  ;;  %s655_s24 = scalar_lea.vmem (!%p108_p1), [#allocation2], %s331_s22 }
  0x28   : > { %529 = dma.done.wait (%p609_p6), %s114_s23, 4096  }
  0x29   : > { %531 = vsyncadd (%p609_p6), %s114_s23, 4294963200  ;;  %v139_v0 = vld [vmem:[%s655_s24] sm:$0xff]  ;;  %v140_v1 = vld [vmem:[%s655_s24 + $0x8] sm:$0xff]  ;;  %s671_s17 = scalar_lea.vmem [#allocation5], %s331_s22  ;;  %s339_s25 = sshll.u32 %s587_s10, 8 }
  0x2a   : > { %v141_v2 = vld [vmem:[%s655_s24 + $0x10] sm:$0xff]  ;;  %390 = vtanh.f32 %v139_v0  ;;  %v142_v3 = vld [vmem:[%s655_s24 + $0x18] sm:$0xff]  ;;  %v143_v4 = vld [vmem:[%s655_s24 + $0x20] sm:$0xff]  ;;  %s247_s28 = scalar_lea.hbm %s761_s1, %s339_s25  ;;  %s248_s10 = sshll.u32 %s671_s17, 4  ;;  %s249_s10 = int_to_ptr.vmem [resolvable:$true] %s248_s10 }
  0x2b   : > { %392 = vtanh.f32 %v140_v1  ;;  %v144_v5 = vld [vmem:[%s655_s24 + $0x28] sm:$0xff]  ;;  %v145_v6 = vld [vmem:[%s655_s24 + $0x30] sm:$0xff]  ;;  %v146_v7 = vld [vmem:[%s655_s24 + $0x38] sm:$0xff]  ;;  %s250_s29 = sshll.u32 %s247_s28, 4  ;;  %s236_s30 = scalar_lea.sflag [#allocation4], %s651_s21  ;;  %s251_s29 = int_to_ptr.hbm [resolvable:$true] %s250_s29 }
  0x2c   : > { %394 = vtanh.f32 %v141_v2  ;;  %v147_v8 = vld [vmem:[%s655_s24 + $0x40] sm:$0xff]  ;;  %v148_v10 = vld [vmem:[%s655_s24 + $0x48] sm:$0xff]  ;;  %v149_v12 = vld [vmem:[%s655_s24 + $0x50] sm:$0xff]  ;;  %s498_s2 = sshra.s32 %s251_s29, 4  ;;  %s504_s11 = scalar_lea.hbm %s761_s1, 1024  ;;  %s499_s2 = int_to_ptr.hbm [resolvable:$true] %s498_s2 }
  0x2d   : > { %396 = vtanh.f32 %v142_v3  ;;  %v150_v14 = vld [vmem:[%s655_s24 + $0x58] sm:$0xff]  ;;  %v151_v16 = vld [vmem:[%s655_s24 + $0x60] sm:$0xff]  ;;  %v152_v18 = vld [vmem:[%s655_s24 + $0x68] sm:$0xff]  ;;  %s500_s3 = scalar_lea.hbm %s499_s2, 256  ;;  %p505_p0 = scmp.lt.s32.totalorder %s499_s2, %s761_s1 }
  0x2e   : > { %398 = vtanh.f32 %v143_v4  ;;  %v153_v20 = vld [vmem:[%s655_s24 + $0x70] sm:$0xff]  ;;  %v154_v22 = vld [vmem:[%s655_s24 + $0x78] sm:$0xff]  ;;  %v155_v24 = vld [vmem:[%s655_s24 + $0x80] sm:$0xff]  ;;  %p501_p6 = scmp.ne.s32.totalorder %s499_s2, %s500_s3  ;;  %p506_p2 = scmp.lt.s32.totalorder %s504_s11, %s500_s3 }
  0x2f   : > { %400 = vtanh.f32 %v144_v5  ;;  %v156_v26 = vld [vmem:[%s655_s24 + $0x88] sm:$0xff]  ;;  %v157_v28 = vld [vmem:[%s655_s24 + $0x90] sm:$0xff]  ;;  %v158_v30 = vld [vmem:[%s655_s24 + $0x98] sm:$0xff] }
  0x30   : > { %v391_v9 = vpop.eup %390  ;;  %402 = vtanh.f32 %v145_v6  ;;  %v159_v32 = vld [vmem:[%s655_s24 + $0xa0] sm:$0xff]  ;;  %v160_v34 = vld [vmem:[%s655_s24 + $0xa8] sm:$0xff]  ;;  %v161_v36 = vld [vmem:[%s655_s24 + $0xb0] sm:$0xff]  ;;  %p502_p12 = pnand %p501_p6, %p615_p10  ;;  %p507_p3 = por %p506_p2, %p505_p0 }
  0x31   : > { %v393_v11 = vpop.eup %392  ;;  %203 = vst [vmem:[%s671_s17] sm:$0xff] %v391_v9  ;;  %404 = vtanh.f32 %v146_v7  ;;  %v162_v38 = vld [vmem:[%s655_s24 + $0xb8] sm:$0xff]  ;;  %v163_v40 = vld [vmem:[%s655_s24 + $0xc0] sm:$0xff]  ;;  %v164_v42 = vld [vmem:[%s655_s24 + $0xc8] sm:$0xff] }
  0x32   : > { %v395_v13 = vpop.eup %394  ;;  %204 = vst [vmem:[%s671_s17 + $0x8] sm:$0xff] %v393_v11  ;;  %406 = vtanh.f32 %v147_v8  ;;  %v165_v44 = vld [vmem:[%s655_s24 + $0xd0] sm:$0xff]  ;;  %v166_v46 = vld [vmem:[%s655_s24 + $0xd8] sm:$0xff]  ;;  %v167_v48 = vld [vmem:[%s655_s24 + $0xe0] sm:$0xff]  ;;  %p503_p13 = pneg %p502_p12 }
  0x33   : > { %v397_v15 = vpop.eup %396  ;;  %205 = vst [vmem:[%s671_s17 + $0x10] sm:$0xff] %v395_v13  ;;  %408 = vtanh.f32 %v148_v10  ;;  %v168_v50 = vld [vmem:[%s655_s24 + $0xe8] sm:$0xff]  ;;  %v169_v52 = vld [vmem:[%s655_s24 + $0xf0] sm:$0xff]  ;;  %v170_v54 = vld [vmem:[%s655_s24 + $0xf8] sm:$0xff] }
  0x34   : > { %v399_v17 = vpop.eup %398  ;;  %206 = vst [vmem:[%s671_s17 + $0x18] sm:$0xff] %v397_v15  ;;  %410 = vtanh.f32 %v149_v12  ;;  %p508_p4 = pnand %p507_p3, %p503_p13 }
  0x35   : > { %v401_v19 = vpop.eup %400  ;;  %207 = vst [vmem:[%s671_s17 + $0x20] sm:$0xff] %v399_v17  ;;  %412 = vtanh.f32 %v150_v14 }
  0x36   : > { %v403_v21 = vpop.eup %402  ;;  %208 = vst [vmem:[%s671_s17 + $0x28] sm:$0xff] %v401_v19  ;;  %414 = vtanh.f32 %v151_v16 }
  0x37   : > { %v405_v23 = vpop.eup %404  ;;  %209 = vst [vmem:[%s671_s17 + $0x30] sm:$0xff] %v403_v21  ;;  %416 = vtanh.f32 %v152_v18 }
  0x38   : > { %v407_v25 = vpop.eup %406  ;;  %210 = vst [vmem:[%s671_s17 + $0x38] sm:$0xff] %v405_v23  ;;  %418 = vtanh.f32 %v153_v20 }
  0x39   : > { %v409_v27 = vpop.eup %408  ;;  %211 = vst [vmem:[%s671_s17 + $0x40] sm:$0xff] %v407_v25  ;;  %420 = vtanh.f32 %v154_v22 }
  0x3a   : > { %v411_v29 = vpop.eup %410  ;;  %212 = vst [vmem:[%s671_s17 + $0x48] sm:$0xff] %v409_v27  ;;  %422 = vtanh.f32 %v155_v24 }
  0x3b   : > { %v413_v31 = vpop.eup %412  ;;  %213 = vst [vmem:[%s671_s17 + $0x50] sm:$0xff] %v411_v29  ;;  %424 = vtanh.f32 %v156_v26 }
  0x3c   : > { %v415_v33 = vpop.eup %414  ;;  %214 = vst [vmem:[%s671_s17 + $0x58] sm:$0xff] %v413_v31  ;;  %426 = vtanh.f32 %v157_v28 }
  0x3d   : > { %v417_v35 = vpop.eup %416  ;;  %215 = vst [vmem:[%s671_s17 + $0x60] sm:$0xff] %v415_v33  ;;  %428 = vtanh.f32 %v158_v30 }
  0x3e   : > { %v419_v37 = vpop.eup %418  ;;  %216 = vst [vmem:[%s671_s17 + $0x68] sm:$0xff] %v417_v35  ;;  %430 = vtanh.f32 %v159_v32 }
  0x3f   : > { %v421_v39 = vpop.eup %420  ;;  %217 = vst [vmem:[%s671_s17 + $0x70] sm:$0xff] %v419_v37  ;;  %432 = vtanh.f32 %v160_v34 }
  0x40   : > { %v423_v41 = vpop.eup %422  ;;  %218 = vst [vmem:[%s671_s17 + $0x78] sm:$0xff] %v421_v39  ;;  %434 = vtanh.f32 %v161_v36 }
  0x41   : > { %v425_v43 = vpop.eup %424  ;;  %219 = vst [vmem:[%s671_s17 + $0x80] sm:$0xff] %v423_v41  ;;  %436 = vtanh.f32 %v162_v38 }
  0x42   : > { %v427_v45 = vpop.eup %426  ;;  %220 = vst [vmem:[%s671_s17 + $0x88] sm:$0xff] %v425_v43  ;;  %438 = vtanh.f32 %v163_v40 }
  0x43   : > { %v429_v47 = vpop.eup %428  ;;  %221 = vst [vmem:[%s671_s17 + $0x90] sm:$0xff] %v427_v45  ;;  %440 = vtanh.f32 %v164_v42 }
  0x44   : > { %v431_v49 = vpop.eup %430  ;;  %222 = vst [vmem:[%s671_s17 + $0x98] sm:$0xff] %v429_v47  ;;  %442 = vtanh.f32 %v165_v44 }
  0x45   : > { %v433_v51 = vpop.eup %432  ;;  %223 = vst [vmem:[%s671_s17 + $0xa0] sm:$0xff] %v431_v49  ;;  %444 = vtanh.f32 %v166_v46 }
  0x46   : > { %v435_v53 = vpop.eup %434  ;;  %224 = vst [vmem:[%s671_s17 + $0xa8] sm:$0xff] %v433_v51  ;;  %446 = vtanh.f32 %v167_v48 }
  0x47   : > { %v437_v55 = vpop.eup %436  ;;  %225 = vst [vmem:[%s671_s17 + $0xb0] sm:$0xff] %v435_v53  ;;  %448 = vtanh.f32 %v168_v50 }
  0x48   : > { %v439_v56 = vpop.eup %438  ;;  %226 = vst [vmem:[%s671_s17 + $0xb8] sm:$0xff] %v437_v55  ;;  %450 = vtanh.f32 %v169_v52 }
  0x49   : > { %v441_v57 = vpop.eup %440  ;;  %227 = vst [vmem:[%s671_s17 + $0xc0] sm:$0xff] %v439_v56  ;;  %452 = vtanh.f32 %v170_v54 }
  0x4a   : > { %v443_v58 = vpop.eup %442  ;;  %228 = vst [vmem:[%s671_s17 + $0xc8] sm:$0xff] %v441_v57 }
  0x4b   : > { %v445_v59 = vpop.eup %444  ;;  %229 = vst [vmem:[%s671_s17 + $0xd0] sm:$0xff] %v443_v58 }
  0x4c   : > { %v447_v60 = vpop.eup %446  ;;  %230 = vst [vmem:[%s671_s17 + $0xd8] sm:$0xff] %v445_v59 }
  0x4d   : > { %v449_v61 = vpop.eup %448  ;;  %231 = vst [vmem:[%s671_s17 + $0xe0] sm:$0xff] %v447_v60 }
  0x4e   : > { %v451_v62 = vpop.eup %450  ;;  %232 = vst [vmem:[%s671_s17 + $0xe8] sm:$0xff] %v449_v61 }
  0x4f   : > { %v453_v63 = vpop.eup %452  ;;  %233 = vst [vmem:[%s671_s17 + $0xf0] sm:$0xff] %v451_v62 }
  0x50   : > { %234 = vst [vmem:[%s671_s17 + $0xf8] sm:$0xff] %v453_v63 }
  0x51   : > { %511 = shalt.err (!%p508_p4)
}
  0x52   : > { %s554_s16 = smov 128   ;;  %s555_s20 = smov 8  }
  0x53   : > { %342 = dma.vmem_to_hbm [thread:$0]  (%p615_p10), %s249_s10, 4096, %s251_s29, %s236_s30, %s554_s16, %s554_s16, %s555_s20  }
  0x54 PF: > { %p353_p5 = scmp.ge.s32.totalorder %s550_s9, 2  ;;  %s265_s21 = sand.u32 1, %s538_s6  }
  0x55   : > { %s266_s22 = scalar_lea.sflag [#allocation4], %s265_s21 }
  0x56   : > { %p349_p7 = pnand %p353_p5, %p619_p11 }
  0x58   : > { %p350_p8 = pneg %p349_p7 }
  0x5a   : > { %533 = dma.done.wait (%p350_p8), %s266_s22, 4096  }
  0x5b   : > { %535 = vsyncadd (%p350_p8), %s266_s22, 4294963200  ;;  %p14_p9 = scmp.ge.s32.totalorder %s591_s12, 6   ;;  %s767_s6 = smov %s542_s7 }
  0x5c   : > { %s768_s7 = smov %s546_s8  ;;  %s769_s8 = smov %s603_s15 }
  0x5d   : > { %s770_s9 = smov %s591_s12  ;;  %16 = sbr.rel (!%p14_p9) target bundleno = 5 (0x5), region = 69 }
  0x62   :  { %272 = vsyncpa [#allocation3], 1 }
  0x63   :  { %274 = vsyncpa [#allocation3 + $0x1], 1 }
  0x64   :  { %275 = vsyncpa [#allocation4], 1 }
  0x65   :  { %277 = vsyncpa [#allocation4 + $0x1], 1 }

</bundles_post_ra>
